<compile_context>
chip_gen: v7x
topology: tpu7x:2x2x1
jax: 0.10.0
libtpu: 0.0.40
codegen_flags: <defaults>
</compile_context>

<pallas_src>
import functools

import jax
import jax.numpy as jnp
from jax.experimental import pallas as pl
from jax.experimental.pallas import tpu as pltpu


# -----------------------------------------------------------------------------
# Hardware / budget helpers (static Python, evaluated once at import)
# -----------------------------------------------------------------------------
def _device_kind():
    try:
        return jax.devices()[0].device_kind.lower()
    except Exception:
        return ""


def _vmem_capacity_bytes():
    try:
        info = pltpu.get_tpu_info()
        cap = getattr(info, "vmem_capacity_bytes", None)
        if cap:
            return int(cap)
    except Exception:
        pass
    # Per-generation fallback: v7x has 64 MiB / TensorCore, v5e/v6e have 128 MiB.
    return (64 if "v7" in _device_kind() else 128) * 1024 * 1024


def _num_tensorcores():
    kind = _device_kind()
    # v7x exposes 2 TensorCores per chip; v4 is a 2-TC megacore.  v5e/v6e: 1 TC.
    return 2 if ("v7" in kind or "v4" in kind) else 1


_VMEM_CAP = _vmem_capacity_bytes()
_NUM_TC = _num_tensorcores()


def _weight_bytes(C, mid):
    # two f32 weight matrices + two f32 biases
    return 4 * (2 * mid * C + mid + C)


def _choose_hw_tile(HW, budget, C, itemsize, wbytes):
    """Largest 128-multiple HW tile fitting the two-pass VMEM budget (cdiv grid,
    ragged tail is masked, so the tile need not divide HW)."""
    hw_pad = ((HW + 127) // 128) * 128
    # pass 2 double-buffers input + output tiles (4x); allow f32 temps in pass 1.
    denom = 4 * C * itemsize + 2 * C * 4
    max_thw = max(0, budget - 2 * wbytes) // max(1, denom)
    thw = (max_thw // 128) * 128
    return max(128, min(thw, hw_pad))


# -----------------------------------------------------------------------------
# Fused single-pass kernel: pool + gate MLP + scale on one (nb, C, HW) slab
# -----------------------------------------------------------------------------
def _fused_kernel(x_ref, wa_ref, b1_ref, wb_ref, b2_ref, o_ref, *, inv_hw,
                  use_vpu_mlp):
    x = x_ref[...]                                               # (nb, C, HW)
    # AdaptiveAvgPool2d(1): f32 accumulation over the lane axis.
    pooled = jnp.sum(x, axis=-1, dtype=jnp.float32) * inv_hw     # (nb, C) f32

    if use_vpu_mlp:
        # Tiny gate MLP on the VPU (broadcast-multiply + lane reduce): avoids the
        # MXU push/pop latency on the serial per-step path for small C*mid.
        w1 = wa_ref[...]                                         # (mid, C) f32
        w2 = wb_ref[...]                                         # (C, mid) f32
        h = jnp.sum(pooled[:, None, :] * w1[None, :, :], axis=-1) + b1_ref[...]
        h = jnp.maximum(h, 0.0)                                  # (nb, mid)
        a = jnp.sum(h[:, None, :] * w2[None, :, :], axis=-1) + b2_ref[...]
    else:
        # Larger C: two small MXU matmuls (weights pre-transposed outside).
        h = jnp.dot(pooled, wa_ref[...], preferred_element_type=jnp.float32)
        h = jnp.maximum(h + b1_ref[...], 0.0)                    # (nb, mid)
        a = jnp.dot(h, wb_ref[...], preferred_element_type=jnp.float32) + b2_ref[...]

    gate = jax.nn.sigmoid(a).astype(o_ref.dtype)                 # (nb, C)
    # Apply the gate in the input dtype (no full-slab f32 cast on the scale path).
    o_ref[...] = x * gate[:, :, None]


def _fused_channel_attention(x2, w1, b1, w2, b2, nb, in_bufs, out_bufs,
                             f32_pool_extra_per_n):
    N, C, HW = x2.shape
    mid = w1.shape[0]
    itemsize = jnp.dtype(x2.dtype).itemsize
    use_vpu_mlp = (C <= 128 and mid <= 128)

    if use_vpu_mlp:
        wa, wb = w1, w2                  # natural layouts: (mid, C), (C, mid)
    else:
        wa, wb = w1.T, w2.T              # pre-transposed for row-major MXU dots
    wa = wa.astype(jnp.float32)
    wb = wb.astype(jnp.float32)
    b1r = b1.reshape(1, mid).astype(jnp.float32)
    b2r = b2.reshape(1, C).astype(jnp.float32)

    block_bytes = nb * C * HW * itemsize
    wbytes = _weight_bytes(C, mid)
    needed = ((in_bufs + out_bufs) * block_bytes
              + nb * f32_pool_extra_per_n + 2 * wbytes)
    vmem_limit = int(min(int(_VMEM_CAP * 0.95),
                         max(needed + (8 << 20), 32 << 20)))

    cost = pl.CostEstimate(
        flops=int(2 * N * C * HW + 4 * N * C * mid),
        transcendentals=int(N * C),
        bytes_accessed=int(2 * N * C * HW * itemsize + wbytes),
    )

    kernel = functools.partial(_fused_kernel, inv_hw=1.0 / HW,
                               use_vpu_mlp=use_vpu_mlp)

    # Single-buffer the big blocks only on the "medium" path (v7x VMEM squeeze);
    # the default (double-buffered) path never touches pipeline_mode.
    if in_bufs >= 2:
        x_spec = pl.BlockSpec((nb, C, HW), lambda n: (n, 0, 0))
    else:
        x_spec = pl.BlockSpec((nb, C, HW), lambda n: (n, 0, 0),
                              pipeline_mode=pl.Buffered(1))
    if out_bufs >= 2:
        o_spec = pl.BlockSpec((nb, C, HW), lambda n: (n, 0, 0))
    else:
        o_spec = pl.BlockSpec((nb, C, HW), lambda n: (n, 0, 0),
                              pipeline_mode=pl.Buffered(1))

    return pl.pallas_call(
        kernel,
        out_shape=jax.ShapeDtypeStruct((N, C, HW), x2.dtype),
        grid_spec=pltpu.PrefetchScalarGridSpec(
            num_scalar_prefetch=0,
            grid=(N // nb,),
            in_specs=[
                x_spec,
                pl.BlockSpec(wa.shape, lambda n: (0, 0)),
                pl.BlockSpec(b1r.shape, lambda n: (0, 0)),
                pl.BlockSpec(wb.shape, lambda n: (0, 0)),
                pl.BlockSpec(b2r.shape, lambda n: (0, 0)),
            ],
            out_specs=o_spec,
        ),
        compiler_params=pltpu.CompilerParams(
            dimension_semantics=("parallel",),
            vmem_limit_bytes=vmem_limit,
        ),
        cost_estimate=cost,
    )(x2, wa, b1r, wb, b2r)


# -----------------------------------------------------------------------------
# Two-pass fallback (only when even a single-buffered fused slab can't fit):
#   pass 1: per-image pooled sums over 128-aligned HW tiles (masked tail) -> gate
#   pass 2: lane-dense tiled scale  out = x * gate   (gate already in x.dtype)
# Costs one extra read of x (3x vs 2x HBM traffic) but runs for any shape.
# -----------------------------------------------------------------------------
def _pool_gate_kernel(x_ref, w1_ref, b1_ref, w2_ref, b2_ref, g_ref, acc_ref, *,
                      inv_hw, thw, hw_total, needs_mask):
    k = pl.program_id(1)

    @pl.when(k == 0)
    def _():
        acc_ref[...] = jnp.zeros_like(acc_ref)

    x = x_ref[...]                                               # (C, thw)
    if needs_mask:
        lane = jax.lax.broadcasted_iota(jnp.int32, x.shape, 1)
        x = jnp.where(lane < hw_total - k * thw, x, jnp.zeros_like(x))
    acc_ref[...] += jnp.sum(x, axis=-1, keepdims=True, dtype=jnp.float32)

    @pl.when(k == pl.num_programs(1) - 1)
    def _():
        pooled = acc_ref[...] * inv_hw                           # (C, 1) f32
        h = jnp.dot(w1_ref[...], pooled, preferred_element_type=jnp.float32)
        h = jnp.maximum(h + b1_ref[...], 0.0)                    # (mid, 1)
        a = jnp.dot(w2_ref[...], h, preferred_element_type=jnp.float32) + b2_ref[...]
        g_ref[...] = jax.nn.sigmoid(a).astype(g_ref.dtype)       # (C, 1)


def _scale_kernel(g_ref, x_ref, o_ref):
    # gate is (C, 1) in x.dtype already: no per-tile cast, broadcast over lanes.
    o_ref[...] = x_ref[...] * g_ref[...]


def _two_pass_channel_attention(x2, w1, b1, w2, b2, thw):
    N, C, HW = x2.shape
    mid = w1.shape[0]
    itemsize = jnp.dtype(x2.dtype).itemsize
    kt = pl.cdiv(HW, thw)

    w1f = w1.astype(jnp.float32)
    w2f = w2.astype(jnp.float32)
    b1c = b1.reshape(mid, 1).astype(jnp.float32)
    b2c = b2.reshape(C, 1).astype(jnp.float32)

    wbytes = _weight_bytes(C, mid)
    tile_bytes = C * thw * itemsize
    vmem_limit = int(min(int(_VMEM_CAP * 0.95),
                         max(4 * tile_bytes + 2 * C * thw * 4 + 2 * wbytes + (8 << 20),
                             32 << 20)))

    pool_kernel = functools.partial(_pool_gate_kernel, inv_hw=1.0 / HW, thw=thw,
                                    hw_total=HW, needs_mask=(HW % thw) != 0)
    pool_cost = pl.CostEstimate(
        flops=int(N * C * HW + 4 * N * C * mid),
        transcendentals=int(N * C),
        bytes_accessed=int(N * C * HW * itemsize + wbytes + N * C * itemsize),
    )
    gate = pl.pallas_call(
        pool_kernel,
        out_shape=jax.ShapeDtypeStruct((N, C, 1), x2.dtype),
        grid_spec=pltpu.PrefetchScalarGridSpec(
            num_scalar_prefetch=0,
            grid=(N, kt),
            in_specs=[
                pl.BlockSpec((pl.Squeezed(), C, thw), lambda n, k: (n, 0, k)),
                pl.BlockSpec((mid, C), lambda n, k: (0, 0)),
                pl.BlockSpec((mid, 1), lambda n, k: (0, 0)),
                pl.BlockSpec((C, mid), lambda n, k: (0, 0)),
                pl.BlockSpec((C, 1), lambda n, k: (0, 0)),
            ],
            out_specs=pl.BlockSpec((pl.Squeezed(), C, 1), lambda n, k: (n, 0, 0)),
            scratch_shapes=[pltpu.VMEM((C, 1), jnp.float32)],
        ),
        compiler_params=pltpu.CompilerParams(
            dimension_semantics=("parallel", "arbitrary"),
            vmem_limit_bytes=vmem_limit,
        ),
        cost_estimate=pool_cost,
    )(x2, w1f, b1c, w2f, b2c)

    scale_cost = pl.CostEstimate(
        flops=int(N * C * HW),
        transcendentals=0,
        bytes_accessed=int(2 * N * C * HW * itemsize + N * C * itemsize),
    )
    out2 = pl.pallas_call(
        _scale_kernel,
        out_shape=jax.ShapeDtypeStruct((N, C, HW), x2.dtype),
        grid_spec=pltpu.PrefetchScalarGridSpec(
            num_scalar_prefetch=0,
            grid=(N, kt),
            in_specs=[
                pl.BlockSpec((pl.Squeezed(), C, 1), lambda n, k: (n, 0, 0)),
                pl.BlockSpec((pl.Squeezed(), C, thw), lambda n, k: (n, 0, k)),
            ],
            out_specs=pl.BlockSpec((pl.Squeezed(), C, thw), lambda n, k: (n, 0, k)),
        ),
        compiler_params=pltpu.CompilerParams(
            dimension_semantics=("parallel", "parallel"),
            vmem_limit_bytes=vmem_limit,
        ),
        cost_estimate=scale_cost,
    )(gate, x2)
    return out2


# -----------------------------------------------------------------------------
# Public wrapper
# -----------------------------------------------------------------------------
def channel_attention(x, w1, b1, w2, b2):
    """x: (N, C, H, W); w1: (mid, C); b1: (mid,); w2: (C, mid); b2: (C,)."""
    N, C, H, W = x.shape
    HW = H * W
    mid = w1.shape[0]
    itemsize = jnp.dtype(x.dtype).itemsize
    x2 = x.reshape(N, C, HW)

    # TODO(synk): for small-HW / large-C shapes an (N, HW, C) channel-last view
    # (C on lanes) avoids masked stores and lane padding, but a standalone
    # transpose here would cost an extra HBM round trip, so NCHW is kept.
    # TODO(synk): for C below the sublane packing (8 f32 / 16 bf16), folding N*C
    # (or part of HW) into the second-minor axis would recover padded sublanes.

    wbytes = _weight_bytes(C, mid)
    budget = int(_VMEM_CAP * 0.75)                 # planning headroom under VMEM
    slab = C * HW * itemsize                       # one batch element, one copy
    f32_extra = C * HW * 4 if itemsize < 4 else 0  # f32 pooling-temp allowance

    def fits(nb, in_bufs, out_bufs):
        return nb * ((in_bufs + out_bufs) * slab + f32_extra) + 2 * wbytes <= budget

    # On multi-TC chips a single fused grid step streams HBM from one core only;
    # for single-image inputs with a non-trivial feature map prefer the two-pass
    # structure whose (bandwidth-bound) scale pass parallelizes over HW tiles.
    prefer_two_pass = (_NUM_TC >= 2 and N == 1 and HW >= 512)

    if not prefer_two_pass:
        # Prefer fully double-buffered fused blocks; degrade to single-buffered
        # ("medium" path, mainly v7x's 64 MiB VMEM) before the 3x-traffic fallback.
        for in_bufs, out_bufs in ((2, 2), (2, 1), (1, 1)):
            nb_max = 0
            for nb_try in range(1, N + 1):
                if N % nb_try == 0 and fits(nb_try, in_bufs, out_bufs):
                    nb_max = nb_try
            if nb_max == 0:
                continue
            nb = nb_max
            if _NUM_TC >= 2 and N >= 2:
                # Keep >= 2 grid steps so the parallel N axis feeds both cores.
                # (Single-TC v5e/v6e take the largest slab instead: extra steps
                # only add ~0.35 us each and shrink tiles off the HBM roofline.)
                cap_nb = max(1, N // 2)
                nb = max(d for d in range(1, min(nb, cap_nb) + 1) if N % d == 0)
            out2 = _fused_channel_attention(x2, w1, b1, w2, b2, nb, in_bufs,
                                            out_bufs, f32_extra)
            return out2.reshape(N, C, H, W)

    thw = _choose_hw_tile(HW, budget, C, itemsize, wbytes)
    out2 = _two_pass_channel_attention(x2, w1, b1, w2, b2, thw)
    return out2.reshape(N, C, H, W)


# -----------------------------------------------------------------------------
# Params / reference / demo
# -----------------------------------------------------------------------------
def init_params(key, channels, reduction=4):
    """Deterministic init mimicking nn.Conv2d defaults (1x1 convs => matrices)."""
    mid = max(2, channels // reduction)
    k1, k2, k3, k4 = jax.random.split(key, 4)
    bound1 = 1.0 / (channels ** 0.5)
    bound2 = 1.0 / (mid ** 0.5)
    w1 = jax.random.uniform(k1, (mid, channels), jnp.float32, -bound1, bound1)
    b1 = jax.random.uniform(k2, (mid,), jnp.float32, -bound1, bound1)
    w2 = jax.random.uniform(k3, (channels, mid), jnp.float32, -bound2, bound2)
    b2 = jax.random.uniform(k4, (channels,), jnp.float32, -bound2, bound2)
    return w1, b1, w2, b2


def reference(x, w1, b1, w2, b2):
    pooled = jnp.mean(x, axis=(2, 3))                      # (N, C)
    h = jnp.maximum(pooled @ w1.T + b1, 0.0)               # (N, mid)
    a = jax.nn.sigmoid(h @ w2.T + b2)                      # (N, C)
    return x * a[:, :, None, None]


if __name__ == "__main__":
    key = jax.random.PRNGKey(0)
    kx, kp = jax.random.split(key)

    N, C, H, W = 2, 4, 16, 16
    x = jax.random.normal(kx, (N, C, H, W), jnp.float32)
    w1, b1, w2, b2 = init_params(kp, C, reduction=4)

    out = jax.block_until_ready(channel_attention(x, w1, b1, w2, b2))
    ref = reference(x, w1, b1, w2, b2)

    assert out.shape == (N, C, H, W)
    assert jnp.allclose(out, ref, atol=1e-5, rtol=1e-5), \
        float(jnp.max(jnp.abs(out - ref)))
    print("KERNEL_OK")
</pallas_src>

<mosaic_0001>
module attributes {stable_mosaic.version = 11 : i64} {
  func.func @_fused_kernel(%arg0: i32, %arg1: memref<2x4x256xf32, #tpu.memory_space<vmem>>, %arg2: memref<2x4xf32, #tpu.memory_space<vmem>>, %arg3: memref<1x2xf32, #tpu.memory_space<vmem>>, %arg4: memref<4x2xf32, #tpu.memory_space<vmem>>, %arg5: memref<1x4xf32, #tpu.memory_space<vmem>>, %arg6: memref<2x4x256xf32, #tpu.memory_space<vmem>>) attributes {dimension_semantics = [#tpu.dimension_semantics<parallel>], iteration_bounds = array<i64: 1>, scalar_prefetch = 0 : i64, scratch_operands = 0 : i64, tpu.core_type = #tpu.core_type<tc>, window_params = [{transform_indices = @transform_0, window_bounds = array<i64: 2, 4, 256>}, {pipeline_mode = #tpu.pipeline_mode<synchronous>, transform_indices = @transform_1, window_bounds = array<i64: 2, 4>}, {pipeline_mode = #tpu.pipeline_mode<synchronous>, transform_indices = @transform_2, window_bounds = array<i64: 1, 2>}, {pipeline_mode = #tpu.pipeline_mode<synchronous>, transform_indices = @transform_3, window_bounds = array<i64: 4, 2>}, {pipeline_mode = #tpu.pipeline_mode<synchronous>, transform_indices = @transform_4, window_bounds = array<i64: 1, 4>}, {transform_indices = @transform_5, window_bounds = array<i64: 2, 4, 256>}]} {
    %c0 = arith.constant 0 : index
    %c0_0 = arith.constant 0 : index
    %c0_1 = arith.constant 0 : index
    %0 = vector.load %arg1[%c0, %c0_0, %c0_1] : memref<2x4x256xf32, #tpu.memory_space<vmem>>, vector<2x4x256xf32>
    %cst = arith.constant dense<0.000000e+00> : vector<2x4xf32>
    %1 = vector.multi_reduction <add>, %0, %cst [2] : vector<2x4x256xf32> to vector<2x4xf32>
    %cst_2 = arith.constant 3.906250e-03 : f32
    %2 = vector.broadcast %cst_2 : f32 to vector<2x4xf32>
    %3 = arith.mulf %1, %2 : vector<2x4xf32>
    %c0_3 = arith.constant 0 : index
    %c0_4 = arith.constant 0 : index
    %4 = vector.load %arg2[%c0_3, %c0_4] : memref<2x4xf32, #tpu.memory_space<vmem>>, vector<2x4xf32>
    %c0_5 = arith.constant 0 : index
    %c0_6 = arith.constant 0 : index
    %5 = vector.load %arg4[%c0_5, %c0_6] : memref<4x2xf32, #tpu.memory_space<vmem>>, vector<4x2xf32>
    %6 = vector.shape_cast %3 : vector<2x4xf32> to vector<2x1x4xf32>
    %7 = vector.shape_cast %4 : vector<2x4xf32> to vector<1x2x4xf32>
    %8 = vector.broadcast %6 : vector<2x1x4xf32> to vector<2x2x4xf32>
    %9 = vector.broadcast %7 : vector<1x2x4xf32> to vector<2x2x4xf32>
    %10 = arith.mulf %8, %9 : vector<2x2x4xf32>
    %cst_7 = arith.constant dense<0.000000e+00> : vector<2x2xf32>
    %11 = vector.multi_reduction <add>, %10, %cst_7 [2] : vector<2x2x4xf32> to vector<2x2xf32>
    %c0_8 = arith.constant 0 : index
    %c0_9 = arith.constant 0 : index
    %12 = vector.load %arg3[%c0_8, %c0_9] : memref<1x2xf32, #tpu.memory_space<vmem>>, vector<1x2xf32>
    %13 = vector.broadcast %12 : vector<1x2xf32> to vector<2x2xf32>
    %14 = arith.addf %11, %13 : vector<2x2xf32>
    %cst_10 = arith.constant 0.000000e+00 : f32
    %15 = vector.broadcast %cst_10 : f32 to vector<2x2xf32>
    %16 = arith.maximumf %14, %15 : vector<2x2xf32>
    %17 = vector.shape_cast %16 : vector<2x2xf32> to vector<2x1x2xf32>
    %18 = vector.shape_cast %5 : vector<4x2xf32> to vector<1x4x2xf32>
    %19 = vector.broadcast %17 : vector<2x1x2xf32> to vector<2x4x2xf32>
    %20 = vector.broadcast %18 : vector<1x4x2xf32> to vector<2x4x2xf32>
    %21 = arith.mulf %19, %20 : vector<2x4x2xf32>
    %cst_11 = arith.constant dense<0.000000e+00> : vector<2x4xf32>
    %22 = vector.multi_reduction <add>, %21, %cst_11 [2] : vector<2x4x2xf32> to vector<2x4xf32>
    %c0_12 = arith.constant 0 : index
    %c0_13 = arith.constant 0 : index
    %23 = vector.load %arg5[%c0_12, %c0_13] : memref<1x4xf32, #tpu.memory_space<vmem>>, vector<1x4xf32>
    %24 = vector.broadcast %23 : vector<1x4xf32> to vector<2x4xf32>
    %25 = arith.addf %22, %24 : vector<2x4xf32>
    %26 = arith.negf %25 : vector<2x4xf32>
    %27 = math.exp %26 : vector<2x4xf32>
    %cst_14 = arith.constant 1.000000e+00 : f32
    %28 = vector.broadcast %cst_14 : f32 to vector<2x4xf32>
    %29 = arith.addf %28, %27 : vector<2x4xf32>
    %30 = arith.divf %28, %29 : vector<2x4xf32>
    %31 = vector.shape_cast %30 : vector<2x4xf32> to vector<2x4x1xf32>
    %32 = vector.broadcast %31 : vector<2x4x1xf32> to vector<2x4x256xf32>
    %33 = arith.mulf %0, %32 : vector<2x4x256xf32>
    %c0_15 = arith.constant 0 : index
    %c0_16 = arith.constant 0 : index
    %c0_17 = arith.constant 0 : index
    %34 = vector.load %arg6[%c0_15, %c0_16, %c0_17] : memref<2x4x256xf32, #tpu.memory_space<vmem>>, vector<2x4x256xf32>
    tpu.vector_store %arg6[%c0_15, %c0_16, %c0_17], %33 {strides = array<i32>} : memref<2x4x256xf32, #tpu.memory_space<vmem>>, vector<2x4x256xf32>,
    return
  }
  func.func @transform_0(%arg0: i32) -> (i32, i32, i32) {
    %c0_i32 = arith.constant 0 : i32
    %c0_i32_0 = arith.constant 0 : i32
    %c0_i32_1 = arith.constant 0 : i32
    return %arg0, %c0_i32, %c0_i32_0 : i32, i32, i32
  }
  func.func @transform_1(%arg0: i32) -> (i32, i32) {
    %c0_i32 = arith.constant 0 : i32
    %c0_i32_0 = arith.constant 0 : i32
    %c0_i32_1 = arith.constant 0 : i32
    return %c0_i32, %c0_i32_0 : i32, i32
  }
  func.func @transform_2(%arg0: i32) -> (i32, i32) {
    %c0_i32 = arith.constant 0 : i32
    %c0_i32_0 = arith.constant 0 : i32
    %c0_i32_1 = arith.constant 0 : i32
    return %c0_i32, %c0_i32_0 : i32, i32
  }
  func.func @transform_3(%arg0: i32) -> (i32, i32) {
    %c0_i32 = arith.constant 0 : i32
    %c0_i32_0 = arith.constant 0 : i32
    %c0_i32_1 = arith.constant 0 : i32
    return %c0_i32, %c0_i32_0 : i32, i32
  }
  func.func @transform_4(%arg0: i32) -> (i32, i32) {
    %c0_i32 = arith.constant 0 : i32
    %c0_i32_0 = arith.constant 0 : i32
    %c0_i32_1 = arith.constant 0 : i32
    return %c0_i32, %c0_i32_0 : i32, i32
  }
  func.func @transform_5(%arg0: i32) -> (i32, i32, i32) {
    %c0_i32 = arith.constant 0 : i32
    %c0_i32_0 = arith.constant 0 : i32
    %c0_i32_1 = arith.constant 0 : i32
    return %arg0, %c0_i32, %c0_i32_0 : i32, i32, i32
  }
}

</mosaic_0001>

<bundles_post_ra>
// kernel: tpu_custom_call.1
= control target key start
LH: loop header
LB: loop body
LE: loop exit
PB: predicated region body
PF: predicated region fallthrough
CT: control target
= control target key end

     0   :  { %10 = vsyncpa [#allocation3], 0  ;;  %s520_s0 = inlined_call_operand.hbm [shape: f32[2,4,256], index: 0, kind: input, shape index: {}]   ;;  %s521_s1 = inlined_call_operand.vmem [shape: f32[2,4], index: 1, kind: input, shape index: {}]   ;;  %s522_s2 = inlined_call_operand.vmem [shape: f32[1,2], index: 2, kind: input, shape index: {}]   ;;  %s523_s3 = inlined_call_operand.vmem [shape: f32[4,2], index: 3, kind: input, shape index: {}]   ;;  %s524_s4 = inlined_call_operand.vmem [shape: f32[1,4], index: 4, kind: input, shape index: {}]   ;;  %s525_s5 = inlined_call_operand.hbm [shape: f32[2,4,256], index: 5, kind: output, shape index: {}]  }
   0x1   :  { %11 = vsyncpa [#allocation4], 0  ;;  %s400_s18 = smov [#allocation2]   ;;  %s352_s22 = scalar_lea.hbm %s520_s0, 256 }
   0x2   :  { %s17_s19 = sshll.u32 %s400_s18, 4  ;;  %p353_p0 = scmp.ne.s32.totalorder %s520_s0, %s352_s22  ;;  %s18_s19 = int_to_ptr.vmem [resolvable:$true] %s17_s19 }
   0x3   :  { %p356_p1 = scmp.lt.u32.totalorder %s352_s22, %s520_s0 }
   0x5   :  { %p358_p2 = pnand %p356_p1, %p353_p0 }
   0x7   :  { %361 = shalt.err (!%p358_p2)
}
   0x8   :  { %s362_s27 = scalar_lea.vmem %s18_s19, 256  ;;  %p367_p4 = scmp.lt.s32.totalorder %s18_s19, %s18_s19 }
   0x9   :  { %p363_p3 = scmp.ne.s32.totalorder %s18_s19, %s362_s27  ;;  %p368_p5 = scmp.lt.s32.totalorder %s362_s27, %s362_s27 }
   0xb   :  { %p369_p6 = por %p368_p5, %p367_p4 }
   0xd   :  { %p370_p7 = pnand %p369_p6, %p363_p3 }
   0xf   :  { %373 = shalt.err (!%p370_p7)
}
  0x10   :  { %s401_s28 = smov 128   ;;  %s402_s29 = smov 8  }
  0x11   :  { %23 = dma.hbm_to_vmem [thread:$0]  %s520_s0, 256, %s18_s19, [#allocation3], %s401_s28, %s401_s28, %s402_s29  }
  0x12   :  { %396 = dma.done.wait [#allocation3], 256  }
  0x13   :  { %397 = vsyncadd [#allocation3], 4294967040  ;;  %v59_v0 = vlaneseq  ;;  %vm43_vm0 = vcmask 1043456   ;;  %v454_v3 = vld [vmem:[#allocation2] sm:$0xff]  ;;  %v456_v4 = vld [vmem:[#allocation2 + $0x8] sm:$0xff]  ;;  %v403_v17 = vmov 0  }
  0x14   :  { %v56_v5 = vld [vmem:[%s521_s1] sm:$0x3]  ;;  %v39_v7 = vcombine.high %v454_v3, %v454_v3  ;;  %v44_v8 = vsel %vm43_vm0, %v454_v3, 0.0  ;;  %v40_v9 = vcombine.high %v456_v4, %v456_v4  ;;  %v49_v12 = vsel %vm43_vm0, %v456_v4, 0.0  ;;  %341 = vset.pattern.permute.xlu1 %v403_v17  ;;  %340 = vset.pattern.permute.xlu0 %v403_v17 }
  0x15   :  { %v451_v1 = vshrl.u32 %v59_v0, 7  ;;  %v330_v28 = vld [vmem:[%s522_s2] ss:$0 sm:$0xff]  ;;  %v96_v32 = vand.u32 127, %v59_v0  ;;  %vm113_vm1 = vcmask 1041409   ;;  %vm118_vm2 = vcmask 25600  }
  0x16   :  { %v45_v11 = vsel %vm43_vm0, %v39_v7, 0.0  ;;  %v50_v13 = vsel %vm43_vm0, %v40_v9, 0.0  ;;  %v57_v29 = vld [vmem:[%s523_s3] sm:$0xf]  ;;  %vm245_vm3 = vcmask 1042434   ;;  %vm247_vm4 = vcmask 1043459  }
  0x17   :  { %v61_v2 = vsub.s32 0, %v451_v1  ;;  %v68_v6 = vsub.s32 1, %v451_v1  ;;  %v46_v14 = vadd.f32 %v45_v11, %v44_v8  ;;  %v51_v16 = vadd.f32 %v50_v13, %v49_v12 }
  0x18   :  { %v475_v33 = vsub.s32 %v96_v32, %v451_v1  ;;  %v156_v46 = vsub.s32 2, %v451_v1  ;;  %v163_v48 = vsub.s32 3, %v451_v1  ;;  %vm254_vm5 = vcmask 11264   ;;  %v331_v32 = vld [vmem:[%s524_s4] ss:$0 sm:$0xff]  ;;  %s405_s4 = smov [#allocation5]  }
  0x19   :  { %v62_v10 = vrot.slane %v56_v5, %v61_v2  ;;  %v69_v15 = vrot.slane %v56_v5, %v68_v6  ;;  %47 = vadd.xlane.f32.xlu0 %v46_v14  ;;  %v143_v30 = vrot.slane %v57_v29, %v61_v2  ;;  %v150_v31 = vrot.slane %v57_v29, %v68_v6  ;;  %s318_s11 = sshll.u32 %s405_s4, 4  ;;  %s319_s11 = int_to_ptr.vmem [resolvable:$true] %s318_s11 }
  0x1a   :  { %v157_v47 = vrot.slane %v57_v29, %v156_v46  ;;  %v164_v49 = vrot.slane %v57_v29, %v163_v48  ;;  %v404_v46 = vmov 839922192   ;;  %s374_s12 = scalar_lea.vmem %s319_s11, 256  ;;  %p379_p9 = scmp.lt.s32.totalorder %s319_s11, %s319_s11 }
  0x1b   :  { %64 = vbcast.lane.b32.xlu1 %v62_v10, 256  ;;  %p375_p8 = scmp.ne.s32.totalorder %s319_s11, %s374_s12  ;;  %p380_p10 = scmp.lt.s32.totalorder %s374_s12, %s374_s12 }
  0x1d   :  { %52 = vadd.xlane.f32.xlu0 %v51_v16  ;;  %p381_p11 = por %p380_p10, %p379_p9 }
  0x1f   :  { %71 = vbcast.lane.b32.xlu1 %v69_v15, 256  ;;  %p382_p12 = pnand %p381_p11, %p375_p8 }
  0x8d   :  { %v65_v18 = vpop.permute.xlu1 %64 }
  0x91   :  { %v72_v20 = vpop.permute.xlu1 %71 }
  0xa6   :  { %v48_v19 = vpop.xlane.xlu0 %47 }
  0xa7   :  { %v54_v21 = vmul.f32 0.00390625, %v48_v19 }
  0xa9   :  { %v75_v22 = vmul.f32 %v65_v18, %v54_v21  ;;  %v76_v23 = vmul.f32 %v72_v20, %v54_v21 }
  0xaa   :  { %v53_v24 = vpop.xlane.xlu0 %52 }
  0xab   :  { %v55_v25 = vmul.f32 0.00390625, %v53_v24  ;;  %87 = vperm.xlu1 %341, %v76_v23   ;;  %84 = vperm.xlu0 %340, %v75_v22  }
  0xad   :  { %v77_v26 = vmul.f32 %v65_v18, %v55_v25  ;;  %v78_v27 = vmul.f32 %v72_v20, %v55_v25 }
  0xaf   :  { %90 = vperm.xlu1 %341, %v77_v26  }
  0xb3   :  { %93 = vperm.xlu1 %341, %v78_v27  }
  0xb7   :  { %132 = vbcast.lane.b32.xlu1 %v330_v28, 256 }
  0xbb   :  { %145 = vbcast.lane.b32.xlu1 %v143_v30, 256 }
  0xbf   :  { %152 = vbcast.lane.b32.xlu1 %v150_v31, 256 }
 0x12a   :  { %v88_v34 = vpop.permute.xlu1 %87  ;;  %v85_v35 = vpop.permute.xlu0 %84 }
 0x12b   :  { %v104_v36 = vrot.slane %v88_v34, %v475_v33  ;;  %v100_v37 = vrot.slane %v85_v35, %v475_v33 }
 0x12d   :  { %v114_v38 = vsel %vm113_vm1, %v104_v36, %v100_v37 }
 0x12e   :  { %v91_v39 = vpop.permute.xlu1 %90  ;;  %v119_v40 = vsel %vm118_vm2, %v114_v38, 0.0 }
 0x12f   :  { %120 = vadd.xlane.f32.xlu1 %v119_v40  ;;  %v108_v42 = vrot.slane %v91_v39, %v475_v33 }
 0x132   :  { %v94_v41 = vpop.permute.xlu1 %93 }
 0x133   :  { %v112_v43 = vrot.slane %v94_v41, %v475_v33 }
 0x135   :  { %v115_v44 = vsel %vm113_vm1, %v112_v43, %v108_v42 }
 0x136   :  { %v122_v45 = vsel %vm118_vm2, %v115_v44, 0.0  ;;  %v133_v50 = vpop.permute.xlu1 %132 }
 0x137   :  { %123 = vadd.xlane.f32.xlu0 %v122_v45 }
 0x13a   :  { %v146_v51 = vpop.permute.xlu1 %145 }
 0x13e   :  { %v153_v52 = vpop.permute.xlu1 %152 }
 0x140   :  { %159 = vbcast.lane.b32.xlu1 %v157_v47, 256  ;;  %v294_v47 = vunpack.c.l.s4 %v404_v46 }
 0x142   :  { %v295_v48 = vunpack.c.0.s8 %v294_v47 }
 0x14d   :  { %166 = vbcast.lane.b32.xlu0 %v164_v49, 256  ;;  %v298_v49 = vsub.s32 %v295_v48, %v451_v1 }
 0x1bc   :  { %v121_v53 = vpop.xlane.xlu1 %120 }
 0x1bd   :  { %v135_v54 = vadd.f32 %v133_v50, %v121_v53 }
 0x1bf   :  { %v137_v55 = vmax.f32 %v135_v54, 0.0 }
 0x1c0   :  { %v160_v61 = vpop.permute.xlu1 %159 }
 0x1c1   :  { %v172_v56 = vmul.f32 %v146_v51, %v137_v55  ;;  %v173_v59 = vmul.f32 %v153_v52, %v137_v55  ;;  %v174_v6 = vmul.f32 %v160_v61, %v137_v55 }
 0x1c3   :  { %189 = vperm.xlu1 %341, %v172_v56  }
 0x1c4   :  { %v124_v57 = vpop.xlane.xlu0 %123 }
 0x1c5   :  { %v136_v58 = vadd.f32 %v133_v50, %v124_v57 }
 0x1c7   :  { %v138_v60 = vmax.f32 %v136_v58, 0.0  ;;  %192 = vperm.xlu1 %341, %v173_v59  }
 0x1c8   :  { %v167_v0 = vpop.permute.xlu0 %166 }
 0x1c9   :  { %v178_v62 = vmul.f32 %v160_v61, %v138_v60  ;;  %v176_v63 = vmul.f32 %v146_v51, %v138_v60  ;;  %v179_v2 = vmul.f32 %v167_v0, %v138_v60  ;;  %v177_v5 = vmul.f32 %v153_v52, %v138_v60 }
 0x1ca   :  { %v175_v7 = vmul.f32 %v167_v0, %v137_v55 }
 0x1cb   :  { %207 = vperm.xlu0 %340, %v178_v62   ;;  %201 = vperm.xlu1 %341, %v176_v63  }
 0x1cf   :  { %204 = vperm.xlu1 %341, %v177_v5   ;;  %210 = vperm.xlu0 %340, %v179_v2  }
 0x1d3   :  { %195 = vperm.xlu1 %341, %v174_v6  }
 0x1d7   :  { %198 = vperm.xlu1 %341, %v175_v7  }
 0x242   :  { %v190_v8 = vpop.permute.xlu1 %189 }
 0x243   :  { %v215_v25 = vrot.slane %v190_v8, %v475_v33 }
 0x246   :  { %v193_v9 = vpop.permute.xlu1 %192 }
 0x247   :  { %v219_v21 = vrot.slane %v193_v9, %v475_v33 }
 0x249   :  { %v244_v27 = vsel %vm113_vm1, %v219_v21, %v215_v25 }
 0x24a   :  { %v202_v10 = vpop.permute.xlu1 %201  ;;  %v208_v11 = vpop.permute.xlu0 %207 }
 0x24b   :  { %v231_v14 = vrot.slane %v202_v10, %v475_v33  ;;  %v239_v16 = vrot.slane %v208_v11, %v475_v33 }
 0x24e   :  { %v205_v12 = vpop.permute.xlu1 %204  ;;  %v211_v13 = vpop.permute.xlu0 %210 }
 0x24f   :  { %v235_v15 = vrot.slane %v205_v12, %v475_v33  ;;  %v243_v18 = vrot.slane %v211_v13, %v475_v33 }
 0x251   :  { %v249_v17 = vsel %vm113_vm1, %v235_v15, %v231_v14 }
 0x252   :  { %v196_v19 = vpop.permute.xlu1 %195  ;;  %v250_v20 = vsel %vm245_vm3, %v239_v16, %v249_v17 }
 0x253   :  { %v251_v22 = vsel %vm247_vm4, %v243_v18, %v250_v20  ;;  %v223_v23 = vrot.slane %v196_v19, %v475_v33 }
 0x254   :  { %v258_v24 = vsel %vm254_vm5, %v251_v22, 0.0 }
 0x255   :  { %259 = vadd.xlane.f32.xlu0 %v258_v24  ;;  %v246_v29 = vsel %vm245_vm3, %v223_v23, %v244_v27 }
 0x256   :  { %v199_v26 = vpop.permute.xlu1 %198 }
 0x257   :  { %v227_v28 = vrot.slane %v199_v26, %v475_v33 }
 0x259   :  { %v248_v30 = vsel %vm247_vm4, %v227_v28, %v246_v29 }
 0x25a   :  { %v255_v31 = vsel %vm254_vm5, %v248_v30, 0.0 }
 0x25b   :  { %256 = vadd.xlane.f32.xlu1 %v255_v31 }
 0x26b   :  { %268 = vbcast.lane.b32.xlu0 %v331_v32, 256 }
 0x2e2   :  { %v260_v34 = vpop.xlane.xlu0 %259 }
 0x2e6   :  { %v269_v35 = vpop.permute.xlu0 %268 }
 0x2e7   :  { %v272_v36 = vadd.f32 %v269_v35, %v260_v34 }
 0x2e8   :  { %v257_v37 = vpop.xlane.xlu1 %256 }
 0x2e9   :  { %v333_v38 = vmul.f32 -1.442695, %v272_v36  ;;  %v271_v39 = vadd.f32 %v269_v35, %v257_v37 }
 0x2eb   :  { %v332_v40 = vmul.f32 -1.442695, %v271_v39  ;;  %344 = vpow2.f32 %v333_v38 }
 0x2ed   :  { %346 = vpow2.f32 %v332_v40 }
 0x2f5   :  { %v345_v33 = vpop.eup %344 }
 0x2f6   :  { %v280_v43 = vadd.f32 1.0, %v345_v33 }
 0x2f7   :  { %v347_v41 = vpop.eup %346 }
 0x2f8   :  { %v279_v42 = vadd.f32 1.0, %v347_v41 }
 0x2fa   :  { %348 = vrcp.f32 %v279_v42 }
 0x2fb   :  { %350 = vrcp.f32 %v280_v43 }
 0x304   :  { %v349_v44 = vpop.eup %348 }
 0x305   :  { %287 = vperm.xlu1 %341, %v349_v44   ;;  %v351_v45 = vpop.eup %350 }
 0x309   :  { %291 = vperm.xlu1 %341, %v351_v45  }
 0x384   :  { %v288_v50 = vpop.permute.xlu1 %287 }
 0x385   :  { %v299_v51 = vrot.slane %v288_v50, %v298_v49 }
 0x387   :  { %v309_v52 = vmul.f32 %v299_v51, %v454_v3 }
 0x388   :  { %v292_v53 = vpop.permute.xlu1 %291 }
 0x389   :  { %311 = vst [vmem:[#allocation5] sm:$0xff] %v309_v52  ;;  %v306_v54 = vrot.slane %v292_v53, %v298_v49 }
 0x38b   :  { %v310_v55 = vmul.f32 %v306_v54, %v456_v4 }
 0x38d   :  { %312 = vst [vmem:[#allocation5 + $0x8] sm:$0xff] %v310_v55 }
 0x38e   :  { %385 = shalt.err (!%p382_p12)
}
 0x38f   :  { %s386_s15 = scalar_lea.hbm %s525_s5, 256 }
 0x390   :  { %p387_p13 = scmp.ne.s32.totalorder %s525_s5, %s386_s15  ;;  %p390_p0 = scmp.lt.u32.totalorder %s386_s15, %s525_s5 }
 0x392   :  { %p392_p1 = pnand %p390_p0, %p387_p13 }
 0x394   :  { %395 = shalt.err (!%p392_p1)
}
 0x395   :  { %324 = dma.vmem_to_hbm [thread:$0]  %s319_s11, 256, %s525_s5, [#allocation4], %s401_s28, %s401_s28, %s402_s29  }
 0x396   :  { %398 = dma.done.wait [#allocation4], 256  }
 0x397   :  { %399 = vsyncadd [#allocation4], 4294967040 }
 0x398   :  { %328 = vsyncpa [#allocation3], 1 }
 0x399   :  { %329 = vsyncpa [#allocation4], 1 }

</bundles_post_ra>
